<compile_context>
chip_gen: v7x
topology: tpu7x:2x2x1
jax: 0.10.0
libtpu: 0.0.40
codegen_flags: <defaults>
</compile_context>

<pallas_src>
import functools

import jax
import jax.numpy as jnp
import numpy as np
from jax.experimental import pallas as pl
from jax.experimental.pallas import tpu as pltpu

LANE = 128  # TPU lane width


def _round_up(x, m):
    return -(-x // m) * m


def critic_kernel(x_ref, w1_ref, b1_ref, w2_ref, b2_ref, w3_ref, b3_ref, o_ref):
    # layer 1: x @ W1 + b1 ; relu6.  x / W1 may be bf16, accumulation is f32.
    h = jnp.dot(x_ref[...], w1_ref[...],
                preferred_element_type=jnp.float32) + b1_ref[...]
    h = jnp.clip(h, 0.0, 6.0)

    # layer 2: h @ W2 + b2 ; relu.
    h = jnp.dot(h.astype(w2_ref.dtype), w2_ref[...],
                preferred_element_type=jnp.float32) + b2_ref[...]
    h = jnp.maximum(h, 0.0)

    # layer 3: q = h @ w3 + b3 as a VPU multiply + lane reduction, packed
    # 128 per-row results per output row so the store / HBM write is lane-dense.
    rows = o_ref.shape[0]                        # tile_b // 128
    h3 = h.reshape(rows, LANE, h.shape[-1])      # split sublane dim (layout-trivial)
    w3 = w3_ref[...].astype(jnp.float32)         # (1, 256), f32 for the VPU
    q = jnp.sum(h3 * w3, axis=-1)                # (rows, 128)
    o_ref[...] = q + b3_ref[...]                 # (1,1) bias broadcasts


@functools.partial(jax.jit, static_argnames=("block_b",))
def critic_forward(state, action, params, *, block_b=2048):
    """state: (B, state_dim), action: (B, action_dim) float32.
    params: dict from pad_params().  Returns (B, 1) float32 Q-values."""
    B = state.shape[0]
    compute_dtype = params["w1"].dtype

    # torch.cat fused in the wrapper; K stays small (do NOT pad K to 128).
    x = jnp.concatenate([state, action], axis=1).astype(compute_dtype)
    in_dim = x.shape[1]

    # Batch tiling: single grid step when the batch fits one block; otherwise
    # tiles of block_b rows (multiple of 1024 so the packed output block is a
    # legal (8k, 128) tile, and B > block_b implies >= 2 steps for v7x).
    block_b = _round_up(block_b, 8 * LANE)
    b_lane = _round_up(B, LANE)
    tile_b = b_lane if b_lane <= block_b else block_b
    n_blocks = pl.cdiv(B, tile_b)
    b_pad = n_blocks * tile_b
    if b_pad != B:
        x = jnp.pad(x, ((0, b_pad - B), (0, 0)))
    rows = tile_b // LANE

    def resident(arr):  # constant index_map -> DMA'd once, stays resident in VMEM
        return pl.BlockSpec(arr.shape, lambda i: (0,) * arr.ndim)

    w_args = (params["w1"], params["b1"], params["w2"], params["b2"],
              params["w3"], params["b3"])

    out_packed = pl.pallas_call(
        critic_kernel,
        out_shape=jax.ShapeDtypeStruct((n_blocks * rows, LANE), jnp.float32),
        grid=(n_blocks,),
        in_specs=[pl.BlockSpec((tile_b, in_dim), lambda i: (i, 0))]
                + [resident(a) for a in w_args],
        out_specs=pl.BlockSpec((rows, LANE), lambda i: (i, 0)),
        compiler_params=pltpu.CompilerParams(
            dimension_semantics=("parallel",),
            vmem_limit_bytes=32 * 1024 * 1024),
    )(x, *w_args)

    # Un-pack: row-major (b_pad//128, 128) -> (b_pad,) -> (B, 1).
    return out_packed.reshape(-1)[:B].reshape(B, 1)


def init_critic_params(key, state_dim, action_dim, hidden_size):
    """PyTorch nn.Linear default init (U(-1/sqrt(fan_in), +1/sqrt(fan_in))).
    Weights stored transposed: (in_features, out_features).  Returns UNPADDED params."""
    input_size = state_dim + action_dim

    def linear(k, fan_in, fan_out):
        kw, kb = jax.random.split(k)
        bound = 1.0 / float(np.sqrt(fan_in))
        w = jax.random.uniform(kw, (fan_in, fan_out), jnp.float32, -bound, bound)
        b = jax.random.uniform(kb, (fan_out,), jnp.float32, -bound, bound)
        return w, b

    k1, k2, k3 = jax.random.split(key, 3)
    w1, b1 = linear(k1, input_size, hidden_size)
    w2, b2 = linear(k2, hidden_size, 256)
    w3, b3 = linear(k3, 256, 1)
    return {"w1": w1, "b1": b1, "w2": w2, "b2": b2, "w3": w3, "b3": b3}


def pad_params(raw, dtype=jnp.bfloat16):
    """Prepare kernel params: hidden dim zero-padded to a lane multiple, w3 stored
    as a (1, 256) row for the VPU reduction, matmul weights cast to `dtype`
    (bf16 recommended on v6e/v7x; accumulation is always f32).  Biases stay f32."""
    hidden = raw["w1"].shape[1]
    h_pad = _round_up(hidden, LANE)
    mid = raw["w2"].shape[1]  # 256
    return {
        "w1": jnp.pad(raw["w1"], ((0, 0), (0, h_pad - hidden))).astype(dtype),
        "b1": jnp.pad(raw["b1"], (0, h_pad - hidden)).reshape(1, h_pad).astype(jnp.float32),
        "w2": jnp.pad(raw["w2"], ((0, h_pad - hidden), (0, 0))).astype(dtype),
        "b2": raw["b2"].reshape(1, mid).astype(jnp.float32),
        "w3": raw["w3"].reshape(1, mid).astype(jnp.float32),
        "b3": raw["b3"].reshape(1, 1).astype(jnp.float32),
    }


def critic_ref_np(state, action, raw):
    """float64 numpy reference matching the PyTorch Critic forward exactly."""
    x = np.concatenate([np.asarray(state, np.float64),
                        np.asarray(action, np.float64)], axis=1)
    w1 = np.asarray(raw["w1"], np.float64); b1 = np.asarray(raw["b1"], np.float64)
    w2 = np.asarray(raw["w2"], np.float64); b2 = np.asarray(raw["b2"], np.float64)
    w3 = np.asarray(raw["w3"], np.float64); b3 = np.asarray(raw["b3"], np.float64)
    h = np.clip(x @ w1 + b1, 0.0, 6.0)          # relu6
    h = np.maximum(h @ w2 + b2, 0.0)            # relu
    return h @ w3 + b3


if __name__ == "__main__":
    state_dim, action_dim, hidden_size = 8, 4, 32

    key = jax.random.PRNGKey(0)
    k_params, k_state, k_action = jax.random.split(key, 3)
    raw = init_critic_params(k_params, state_dim, action_dim, hidden_size)

    state = jax.random.normal(k_state, (2, state_dim), dtype=jnp.float32)
    action = jax.random.normal(k_action, (2, action_dim), dtype=jnp.float32)
    ref = critic_ref_np(state, action, raw)

    # 1) f32 weights, tiny batch (single grid step).  Tolerance allows for the
    #    MXU's multi-pass lowering of f32 matmuls.
    p_f32 = pad_params(raw, jnp.float32)
    out = jax.block_until_ready(critic_forward(state, action, p_f32))
    assert out.shape == (2, 1)
    assert np.allclose(np.asarray(out), ref, atol=2e-2, rtol=2e-2)

    # 2) bf16 resident weights + streamed input (full-rate MXU on v6e/v7x),
    #    f32 accumulation; looser tolerance per the bf16 cast.
    p_bf16 = pad_params(raw, jnp.bfloat16)
    out_bf16 = jax.block_until_ready(critic_forward(state, action, p_bf16))
    assert out_bf16.shape == (2, 1)
    assert np.allclose(np.asarray(out_bf16), ref, atol=5e-2, rtol=5e-2)

    # 3) larger batch: multi-step grid + batch padding + packed-output path.
    kb_s, kb_a = jax.random.split(jax.random.PRNGKey(1))
    state_b = jax.random.normal(kb_s, (1500, state_dim), dtype=jnp.float32)
    action_b = jax.random.normal(kb_a, (1500, action_dim), dtype=jnp.float32)
    out_b = jax.block_until_ready(
        critic_forward(state_b, action_b, p_f32, block_b=1024))
    ref_b = critic_ref_np(state_b, action_b, raw)
    assert out_b.shape == (1500, 1)
    assert np.allclose(np.asarray(out_b), ref_b, atol=2e-2, rtol=2e-2)

    print("KERNEL_OK")
</pallas_src>

<mosaic_0001>
module attributes {stable_mosaic.version = 11 : i64} {
  func.func @critic_kernel(%arg0: i32, %arg1: memref<128x12xf32, #tpu.memory_space<vmem>>, %arg2: memref<12x128xf32, #tpu.memory_space<vmem>>, %arg3: memref<1x128xf32, #tpu.memory_space<vmem>>, %arg4: memref<128x256xf32, #tpu.memory_space<vmem>>, %arg5: memref<1x256xf32, #tpu.memory_space<vmem>>, %arg6: memref<1x256xf32, #tpu.memory_space<vmem>>, %arg7: memref<1x1xf32, #tpu.memory_space<vmem>>, %arg8: memref<1x128xf32, #tpu.memory_space<vmem>>) attributes {dimension_semantics = [#tpu.dimension_semantics<parallel>], iteration_bounds = array<i64: 1>, scalar_prefetch = 0 : i64, scratch_operands = 0 : i64, tpu.core_type = #tpu.core_type<tc>, window_params = [{transform_indices = @transform_0, window_bounds = array<i64: 128, 12>}, {pipeline_mode = #tpu.pipeline_mode<synchronous>, transform_indices = @transform_1, window_bounds = array<i64: 12, 128>}, {pipeline_mode = #tpu.pipeline_mode<synchronous>, transform_indices = @transform_2, window_bounds = array<i64: 1, 128>}, {pipeline_mode = #tpu.pipeline_mode<synchronous>, transform_indices = @transform_3, window_bounds = array<i64: 128, 256>}, {pipeline_mode = #tpu.pipeline_mode<synchronous>, transform_indices = @transform_4, window_bounds = array<i64: 1, 256>}, {pipeline_mode = #tpu.pipeline_mode<synchronous>, transform_indices = @transform_5, window_bounds = array<i64: 1, 256>}, {pipeline_mode = #tpu.pipeline_mode<synchronous>, transform_indices = @transform_6, window_bounds = array<i64: 1, 1>}, {transform_indices = @transform_7, window_bounds = array<i64: 1, 128>}]} {
    %c0 = arith.constant 0 : index
    %c0_0 = arith.constant 0 : index
    %0 = vector.load %arg1[%c0, %c0_0] : memref<128x12xf32, #tpu.memory_space<vmem>>, vector<128x12xf32>
    %c0_1 = arith.constant 0 : index
    %c0_2 = arith.constant 0 : index
    %1 = vector.load %arg2[%c0_1, %c0_2] : memref<12x128xf32, #tpu.memory_space<vmem>>, vector<12x128xf32>
    %cst = arith.constant dense<0.000000e+00> : vector<128x128xf32>
    %2 = tpu.matmul %0, %1, %cst {dimension_numbers = #tpu.dot_dimension_numbers<[1], [0], [0], [1], [0, 0, 1, 1], [], []>} : vector<128x12xf32>, vector<12x128xf32>, vector<128x128xf32> -> vector<128x128xf32>
    %c0_3 = arith.constant 0 : index
    %c0_4 = arith.constant 0 : index
    %3 = vector.load %arg3[%c0_3, %c0_4] : memref<1x128xf32, #tpu.memory_space<vmem>>, vector<1x128xf32>
    %4 = vector.broadcast %3 : vector<1x128xf32> to vector<128x128xf32>
    %5 = arith.addf %2, %4 : vector<128x128xf32>
    %cst_5 = arith.constant 0.000000e+00 : f32
    %cst_6 = arith.constant 6.000000e+00 : f32
    %6 = vector.broadcast %cst_5 : f32 to vector<128x128xf32>
    %7 = arith.maximumf %6, %5 : vector<128x128xf32>
    %8 = vector.broadcast %cst_6 : f32 to vector<128x128xf32>
    %9 = arith.minimumf %8, %7 : vector<128x128xf32>
    %c0_7 = arith.constant 0 : index
    %c0_8 = arith.constant 0 : index
    %10 = vector.load %arg4[%c0_7, %c0_8] : memref<128x256xf32, #tpu.memory_space<vmem>>, vector<128x256xf32>
    %cst_9 = arith.constant dense<0.000000e+00> : vector<128x256xf32>
    %11 = tpu.matmul %9, %10, %cst_9 {dimension_numbers = #tpu.dot_dimension_numbers<[1], [0], [0], [1], [0, 0, 1, 1], [], []>} : vector<128x128xf32>, vector<128x256xf32>, vector<128x256xf32> -> vector<128x256xf32>
    %c0_10 = arith.constant 0 : index
    %c0_11 = arith.constant 0 : index
    %12 = vector.load %arg5[%c0_10, %c0_11] : memref<1x256xf32, #tpu.memory_space<vmem>>, vector<1x256xf32>
    %13 = vector.broadcast %12 : vector<1x256xf32> to vector<128x256xf32>
    %14 = arith.addf %11, %13 : vector<128x256xf32>
    %cst_12 = arith.constant 0.000000e+00 : f32
    %15 = vector.broadcast %cst_12 : f32 to vector<128x256xf32>
    %16 = arith.maximumf %14, %15 : vector<128x256xf32>
    %17 = vector.shape_cast %16 : vector<128x256xf32> to vector<1x128x256xf32>
    %c0_13 = arith.constant 0 : index
    %c0_14 = arith.constant 0 : index
    %18 = vector.load %arg6[%c0_13, %c0_14] : memref<1x256xf32, #tpu.memory_space<vmem>>, vector<1x256xf32>
    %19 = vector.shape_cast %18 : vector<1x256xf32> to vector<1x1x256xf32>
    %20 = vector.broadcast %19 : vector<1x1x256xf32> to vector<1x128x256xf32>
    %21 = arith.mulf %17, %20 : vector<1x128x256xf32>
    %cst_15 = arith.constant dense<0.000000e+00> : vector<1x128xf32>
    %22 = vector.multi_reduction <add>, %21, %cst_15 [2] : vector<1x128x256xf32> to vector<1x128xf32>
    %c0_16 = arith.constant 0 : index
    %c0_17 = arith.constant 0 : index
    %23 = vector.load %arg7[%c0_16, %c0_17] : memref<1x1xf32, #tpu.memory_space<vmem>>, vector<1x1xf32>
    %24 = vector.broadcast %23 : vector<1x1xf32> to vector<1x128xf32>
    %25 = arith.addf %22, %24 : vector<1x128xf32>
    %c0_18 = arith.constant 0 : index
    %c0_19 = arith.constant 0 : index
    %26 = vector.load %arg8[%c0_18, %c0_19] : memref<1x128xf32, #tpu.memory_space<vmem>>, vector<1x128xf32>
    tpu.vector_store %arg8[%c0_18, %c0_19], %25 {strides = array<i32>} : memref<1x128xf32, #tpu.memory_space<vmem>>, vector<1x128xf32>,
    return
  }
  func.func @transform_0(%arg0: i32) -> (i32, i32) {
    %c0_i32 = arith.constant 0 : i32
    %c0_i32_0 = arith.constant 0 : i32
    return %arg0, %c0_i32 : i32, i32
  }
  func.func @transform_1(%arg0: i32) -> (i32, i32) {
    %c0_i32 = arith.constant 0 : i32
    %c0_i32_0 = arith.constant 0 : i32
    %c0_i32_1 = arith.constant 0 : i32
    return %c0_i32, %c0_i32_0 : i32, i32
  }
  func.func @transform_2(%arg0: i32) -> (i32, i32) {
    %c0_i32 = arith.constant 0 : i32
    %c0_i32_0 = arith.constant 0 : i32
    %c0_i32_1 = arith.constant 0 : i32
    return %c0_i32, %c0_i32_0 : i32, i32
  }
  func.func @transform_3(%arg0: i32) -> (i32, i32) {
    %c0_i32 = arith.constant 0 : i32
    %c0_i32_0 = arith.constant 0 : i32
    %c0_i32_1 = arith.constant 0 : i32
    return %c0_i32, %c0_i32_0 : i32, i32
  }
  func.func @transform_4(%arg0: i32) -> (i32, i32) {
    %c0_i32 = arith.constant 0 : i32
    %c0_i32_0 = arith.constant 0 : i32
    %c0_i32_1 = arith.constant 0 : i32
    return %c0_i32, %c0_i32_0 : i32, i32
  }
  func.func @transform_5(%arg0: i32) -> (i32, i32) {
    %c0_i32 = arith.constant 0 : i32
    %c0_i32_0 = arith.constant 0 : i32
    %c0_i32_1 = arith.constant 0 : i32
    return %c0_i32, %c0_i32_0 : i32, i32
  }
  func.func @transform_6(%arg0: i32) -> (i32, i32) {
    %c0_i32 = arith.constant 0 : i32
    %c0_i32_0 = arith.constant 0 : i32
    %c0_i32_1 = arith.constant 0 : i32
    return %c0_i32, %c0_i32_0 : i32, i32
  }
  func.func @transform_7(%arg0: i32) -> (i32, i32) {
    %c0_i32 = arith.constant 0 : i32
    %c0_i32_0 = arith.constant 0 : i32
    return %arg0, %c0_i32 : i32, i32
  }
}

</mosaic_0001>

<bundles_post_ra>
// kernel: critic_forward.1
= control target key start
LH: loop header
LB: loop body
LE: loop exit
PB: predicated region body
PF: predicated region fallthrough
CT: control target
= control target key end

     0   :  { %s1249_s0 = inlined_call_operand.vmem [shape: f32[128,12], index: 0, kind: input, shape index: {}]   ;;  %s1250_s1 = inlined_call_operand.vmem [shape: f32[12,128], index: 1, kind: input, shape index: {}]   ;;  %s1251_s2 = inlined_call_operand.vmem [shape: f32[1,128], index: 2, kind: input, shape index: {}]   ;;  %s1252_s3 = inlined_call_operand.hbm [shape: f32[128,256], index: 3, kind: input, shape index: {}]   ;;  %s1253_s4 = inlined_call_operand.vmem [shape: f32[1,256], index: 4, kind: input, shape index: {}]   ;;  %s1254_s5 = inlined_call_operand.vmem [shape: f32[1,256], index: 5, kind: input, shape index: {}]   ;;  %s1255_s6 = inlined_call_operand.<no memory space> [shape: f32[1,1], index: 6, kind: input, shape index: {}]   ;;  %s1256_s7 = inlined_call_operand.vmem [shape: f32[1,128], index: 7, kind: output, shape index: {}]  }
   0x1   :  { %v12_v0 = vstv %s1255_s6 }
   0x2   :  { %13 = vst [vmem:[#allocation2] sm:$0x1] %v12_v0 }
   0x3   :  { %14 = vsyncpa [#allocation4], 0  ;;  %s936_s26 = smov [#allocation3]   ;;  %s912_s30 = scalar_lea.hbm %s1252_s3, 4096 }
   0x4   :  { %s26_s27 = sshll.u32 %s936_s26, 4  ;;  %p913_p0 = scmp.ne.s32.totalorder %s1252_s3, %s912_s30  ;;  %s27_s27 = int_to_ptr.vmem [resolvable:$true] %s26_s27 }
   0x5   :  { %p916_p1 = scmp.lt.u32.totalorder %s912_s30, %s1252_s3 }
   0x7   :  { %p918_p2 = pnand %p916_p1, %p913_p0 }
   0x9   :  { %921 = shalt.err (!%p918_p2)
}
   0xa   :  { %s922_s6 = scalar_lea.vmem %s27_s27, 4096  ;;  %p927_p4 = scmp.lt.s32.totalorder %s27_s27, %s27_s27 }
   0xb   :  { %p923_p3 = scmp.ne.s32.totalorder %s27_s27, %s922_s6  ;;  %p928_p5 = scmp.lt.s32.totalorder %s922_s6, %s922_s6 }
   0xd   :  { %p929_p6 = por %p928_p5, %p927_p4 }
   0xf   :  { %p930_p7 = pnand %p929_p6, %p923_p3 }
  0x11   :  { %933 = shalt.err (!%p930_p7)
}
  0x12   :  { %s937_s12 = smov 256   ;;  %s938_s13 = smov 16  }
  0x13   :  { %32 = dma.hbm_to_vmem [thread:$0]  %s1252_s3, 4096, %s27_s27, [#allocation4], %s937_s12, %s937_s12, %s938_s13  }
  0x14   :  { %934 = dma.done.wait [#allocation4], 4096  }
  0x15   :  { %935 = vsyncadd [#allocation4], 4294963200  ;;  %vm116_vm0 = vcmask 1043456   ;;  %vm67_vm1 = vcmask 97280   ;;  %vm939_vm2 = vmmov 1   ;;  %v58_v1 = vld [vmem:[%s1250_s1] sm:$0xff] }
  0x16   :  { %vm851_vm3 = vmpackc.low %vm116_vm0, %vm939_vm2  ;;  %v59_v2 = vld [vmem:[%s1250_s1 + $0x8] sm:$0xf]  ;;  %v42_v3 = vld [vmem:[%s1249_s0] sm:$0xff]  ;;  %vm679_vm4 = vcmask 130112   ;;  %vm686_vm5 = vcmask 195712   ;;  %vm693_vm6 = vcmask 261312  }
  0x17   :  { %v850_v4 = vpack.c.bf16 %v59_v2, %v58_v1  ;;  %826 = vmatprep.mubr.msk.f32.mxu0 %vm67_vm1, %v42_v3  ;;  %v43_v5 = vld [vmem:[%s1249_s0 + $0x8] sm:$0xff]  ;;  %v44_v6 = vld [vmem:[%s1249_s0 + $0x10] sm:$0xff]  ;;  %v45_v7 = vld [vmem:[%s1249_s0 + $0x18] sm:$0xff]  ;;  %vm700_vm7 = vcmask 326912   ;;  %vm707_vm8 = vcmask 392512   ;;  %vm714_vm9 = vcmask 458112  }
  0x18   :  { %v298_v8 = vld [vmem:[#allocation3 + $0x8] sm:$0xff]  ;;  %v300_v9 = vld [vmem:[#allocation3 + $0x18] sm:$0xff]  ;;  %v297_v10 = vld [vmem:[#allocation3] sm:$0xff]  ;;  %vm721_vm10 = vcmask 523712   ;;  %vm728_vm11 = vcmask 589312   ;;  %vm735_vm12 = vcmask 654912  }
  0x19   :  { %852 = vmatprep.subr.msk.bf16.mxu0 %vm851_vm3, %v850_v4  ;;  %v856_v11 = vpack.c.bf16 %v300_v9, %v298_v8  ;;  %v299_v12 = vld [vmem:[#allocation3 + $0x10] sm:$0xff]  ;;  %v302_v13 = vld [vmem:[#allocation3 + $0x28] sm:$0xff]  ;;  %v304_v14 = vld [vmem:[#allocation3 + $0x38] sm:$0xff]  ;;  %vm742_vm13 = vcmask 720512   ;;  %vm749_vm14 = vcmask 786112   ;;  %vm756_vm15 = vcmask 851712  }
  0x1a   :  { %855 = vmatpush3.bf16.msk.msra.mxu0 %vm851_vm3, %v850_v4  ;;  %v858_v15 = vpack.c.bf16 %v299_v12, %v297_v10  ;;  %v860_v16 = vpack.c.bf16 %v304_v14, %v302_v13  ;;  %v301_v17 = vld [vmem:[#allocation3 + $0x20] sm:$0xff]  ;;  %v303_v18 = vld [vmem:[#allocation3 + $0x30] sm:$0xff]  ;;  %v306_v19 = vld [vmem:[#allocation3 + $0x48] sm:$0xff]  ;;  %v940_v4 = vmov 0.0   ;;  %vm763_vm0 = vcmask 917312  }
  0x1b   :  { %v46_v20 = vld [vmem:[%s1249_s0 + $0x20] sm:$0xff]  ;;  %857 = vmatprep.subr.bf16.mxu0 %v856_v11  ;;  %888 = vmatprep.subr.bf16.mxu1 %v856_v11  ;;  %v862_v22 = vpack.c.bf16 %v303_v18, %v301_v17  ;;  %v307_v25 = vld [vmem:[#allocation3 + $0x50] sm:$0xff]  ;;  %v47_v26 = vld [vmem:[%s1249_s0 + $0x28] sm:$0xff]  ;;  %vm777_vm2 = vcmask 1048512  }
  0x1c   :  { %v308_v21 = vld [vmem:[#allocation3 + $0x58] sm:$0xff]  ;;  %896 = vmatpush1.bf16.msra.mxu1 %v858_v15  ;;  %v305_v24 = vld [vmem:[#allocation3 + $0x40] sm:$0xff]  ;;  %v310_v27 = vld [vmem:[#allocation3 + $0x68] sm:$0xff]  ;;  %447 = vmatprep.mubr.f32.mxu1 %v940_v4 }
  0x1d   :  { %827 = vmatmul.mubr.msk.f32.vlgmr.msra.gmra.mrb[0].mxu0 %vm67_vm1, %v43_v5  ;;  %v864_v23 = vpack.c.bf16 %v308_v21, %v306_v19  ;;  %v312_v28 = vld [vmem:[#allocation3 + $0x78] sm:$0xff]  ;;  %889 = vmatprep.subr.bf16.mxu1 %v860_v16  ;;  %v48_v29 = vld [vmem:[%s1249_s0 + $0x30] sm:$0xff]  ;;  %v866_v30 = vpack.c.bf16 %v307_v25, %v305_v24  ;;  %v309_v32 = vld [vmem:[#allocation3 + $0x60] sm:$0xff] }
  0x1e   :  { %829 = vmatprep.mubr.msk.f32.mxu0 %vm67_vm1, %v44_v6  ;;  %859 = vmatpush1.bf16.msra.mxu0 %v858_v15  ;;  %v868_v31 = vpack.c.bf16 %v312_v28, %v310_v27  ;;  %v311_v33 = vld [vmem:[#allocation3 + $0x70] sm:$0xff]  ;;  %v314_v35 = vld [vmem:[#allocation3 + $0x88] sm:$0xff]  ;;  %v316_v36 = vld [vmem:[#allocation3 + $0x98] sm:$0xff] }
  0x1f   :  { %861 = vmatprep.subr.bf16.mxu0 %v860_v16  ;;  %v49_v34 = vld [vmem:[%s1249_s0 + $0x38] sm:$0xff]  ;;  %v50_v37 = vld [vmem:[%s1249_s0 + $0x40] sm:$0xff]  ;;  %v870_v38 = vpack.c.bf16 %v311_v33, %v309_v32  ;;  %v872_v39 = vpack.c.bf16 %v316_v36, %v314_v35  ;;  %v51_v42 = vld [vmem:[%s1249_s0 + $0x48] sm:$0xff] }
  0x20   :  { %897 = vmatpush1.bf16.msra.mxu1 %v862_v22  ;;  %v313_v40 = vld [vmem:[#allocation3 + $0x80] sm:$0xff]  ;;  %v315_v41 = vld [vmem:[#allocation3 + $0x90] sm:$0xff]  ;;  %v318_v43 = vld [vmem:[#allocation3 + $0xa8] sm:$0xff] }
  0x21   :  { %830 = vmatmul.mubr.msk.f32.gmra.mrb[2].mxu0 %vm67_vm1, %v45_v7  ;;  %890 = vmatprep.subr.bf16.mxu1 %v864_v23  ;;  %v320_v44 = vld [vmem:[#allocation3 + $0xb8] sm:$0xff]  ;;  %v52_v45 = vld [vmem:[%s1249_s0 + $0x50] sm:$0xff]  ;;  %v874_v46 = vpack.c.bf16 %v315_v41, %v313_v40  ;;  %v317_v48 = vld [vmem:[#allocation3 + $0xa0] sm:$0xff] }
  0x22   :  { %832 = vmatprep.mubr.msk.f32.mxu0 %vm67_vm1, %v46_v20  ;;  %863 = vmatpush1.bf16.msra.mxu0 %v862_v22  ;;  %v876_v47 = vpack.c.bf16 %v320_v44, %v318_v43  ;;  %v319_v49 = vld [vmem:[#allocation3 + $0xb0] sm:$0xff]  ;;  %v322_v51 = vld [vmem:[#allocation3 + $0xc8] sm:$0xff]  ;;  %v324_v52 = vld [vmem:[#allocation3 + $0xd8] sm:$0xff] }
  0x23   :  { %865 = vmatprep.subr.bf16.mxu0 %v864_v23  ;;  %v53_v50 = vld [vmem:[%s1249_s0 + $0x58] sm:$0xff]  ;;  %v54_v53 = vld [vmem:[%s1249_s0 + $0x60] sm:$0xff]  ;;  %v878_v54 = vpack.c.bf16 %v319_v49, %v317_v48  ;;  %v880_v55 = vpack.c.bf16 %v324_v52, %v322_v51  ;;  %v55_v56 = vld [vmem:[%s1249_s0 + $0x68] sm:$0xff] }
  0x24   :  { %898 = vmatpush1.bf16.msra.mxu1 %v866_v30  ;;  %v56_v57 = vld [vmem:[%s1249_s0 + $0x70] sm:$0xff]  ;;  %v57_v58 = vld [vmem:[%s1249_s0 + $0x78] sm:$0xff]  ;;  %v321_v59 = vld [vmem:[#allocation3 + $0xc0] sm:$0xff] }
  0x25   :  { %833 = vmatmul.mubr.msk.f32.gmra.mrb[4].mxu0 %vm67_vm1, %v47_v26  ;;  %891 = vmatprep.subr.bf16.mxu1 %v868_v31  ;;  %v323_v60 = vld [vmem:[#allocation3 + $0xd0] sm:$0xff]  ;;  %v326_v62 = vld [vmem:[#allocation3 + $0xe8] sm:$0xff]  ;;  %v328_v63 = vld [vmem:[#allocation3 + $0xf8] sm:$0xff] }
  0x26   :  { %835 = vmatprep.mubr.msk.f32.mxu0 %vm67_vm1, %v48_v29  ;;  %867 = vmatpush1.bf16.msra.mxu0 %v866_v30  ;;  %v882_v61 = vpack.c.bf16 %v323_v60, %v321_v59  ;;  %v884_v0 = vpack.c.bf16 %v328_v63, %v326_v62  ;;  %v325_v1 = vld [vmem:[#allocation3 + $0xe0] sm:$0xff]  ;;  %v327_v2 = vld [vmem:[#allocation3 + $0xf0] sm:$0xff]  ;;  %v1072_v5 = vld [vmem:[%s1251_s2] ss:$0 sm:$0xff] }
  0x27   :  { %869 = vmatprep.subr.bf16.mxu0 %v868_v31  ;;  %v886_v3 = vpack.c.bf16 %v327_v2, %v325_v1 }
  0x28   :  { %899 = vmatpush1.bf16.msra.mxu1 %v870_v38 }
  0x29   :  { %836 = vmatmul.mubr.msk.f32.gmra.mrb[6].mxu0 %vm67_vm1, %v49_v34  ;;  %892 = vmatprep.subr.bf16.mxu1 %v872_v39 }
  0x2a   :  { %838 = vmatprep.mubr.msk.f32.mxu0 %vm67_vm1, %v50_v37  ;;  %871 = vmatpush1.bf16.msra.mxu0 %v870_v38 }
  0x2b   :  { %873 = vmatprep.subr.bf16.mxu0 %v872_v39 }
  0x2c   :  { %900 = vmatpush1.bf16.msra.mxu1 %v874_v46 }
  0x2d   :  { %839 = vmatmul.mubr.msk.f32.gmra.mrb[8].mxu0 %vm67_vm1, %v51_v42  ;;  %893 = vmatprep.subr.bf16.mxu1 %v876_v47 }
  0x2e   :  { %841 = vmatprep.mubr.msk.f32.mxu0 %vm67_vm1, %v52_v45  ;;  %875 = vmatpush1.bf16.msra.mxu0 %v874_v46 }
  0x2f   :  { %877 = vmatprep.subr.bf16.mxu0 %v876_v47 }
  0x30   :  { %901 = vmatpush1.bf16.msra.mxu1 %v878_v54 }
  0x31   :  { %842 = vmatmul.mubr.msk.f32.gmra.mrb[10].mxu0 %vm67_vm1, %v53_v50  ;;  %894 = vmatprep.subr.bf16.mxu1 %v880_v55 }
  0x32   :  { %844 = vmatprep.mubr.msk.f32.mxu0 %vm67_vm1, %v54_v53  ;;  %879 = vmatpush1.bf16.msra.mxu0 %v878_v54 }
  0x33   :  { %881 = vmatprep.subr.bf16.mxu0 %v880_v55 }
  0x34   :  { %902 = vmatpush1.bf16.msra.mxu1 %v882_v61 }
  0x35   :  { %845 = vmatmul.mubr.msk.f32.gmra.mrb[12].mxu0 %vm67_vm1, %v55_v56  ;;  %895 = vmatprep.subr.bf16.mxu1 %v884_v0 }
  0x36   :  { %847 = vmatprep.mubr.msk.f32.mxu0 %vm67_vm1, %v56_v57  ;;  %883 = vmatpush1.bf16.msra.mxu0 %v882_v61 }
  0x37   :  { %885 = vmatprep.subr.bf16.mxu0 %v884_v0 }
  0x38   :  { %903 = vmatpush1.bf16.msra.mxu1 %v886_v3 }
  0x39   :  { %848 = vmatmul.mubr.msk.f32.gmra.mrb[14].mxu0 %vm67_vm1, %v57_v58  ;;  %vm770_vm1 = vcmask 982912  }
  0x3a   :  { %887 = vmatpush1.bf16.msra.mxu0 %v886_v3  ;;  %405 = vmatprep.mubr.f32.mxu0 %v940_v4 }
  0xf0   :  { %v828_v6 = vpop.f32.mrb[0].mxu0 }
  0xf1   :  { %v186_v7 = vpop.f32.mrb[1].mxu0  ;;  %v192_v8 = vadd.f32 %v828_v6, %v1072_v5 }
  0xf2   :  { %v187_v9 = vadd.f32 %v1072_v5, %v186_v7 }
  0xf3   :  { %v266_v13 = vmax.f32 %v192_v8, 0.0  ;;  %v941_v8 = vmov 0  }
  0xf4   :  { %v265_v10 = vmax.f32 %v187_v9, 0.0  ;;  %v831_v11 = vpop.f32.mrb[2].mxu0  ;;  %910 = vset.pattern.permute.xlu1 %v941_v8  ;;  %911 = vset.pattern.permute.xlu0 %v941_v8  ;;  %v331_v9 = vlaneseq }
  0xf5   :  { %v196_v12 = vpop.f32.mrb[3].mxu0  ;;  %v282_v19 = vmin.f32 %v266_v13, 6.0  ;;  %v202_v20 = vadd.f32 %v831_v11, %v1072_v5  ;;  %v329_v11 = vld [vmem:[%s1253_s4] sm:$0x3] }
  0xf6   :  { %v281_v14 = vmin.f32 %v265_v10, 6.0  ;;  %v197_v15 = vadd.f32 %v1072_v5, %v196_v12 }
  0xf7   :  { %v268_v26 = vmax.f32 %v202_v20, 0.0 }
  0xf8   :  { %v267_v16 = vmax.f32 %v197_v15, 0.0  ;;  %406 = vmatmul.mubr.f32.vlgmr.msra.gmra.mrb[16].mxu0 %v281_v14  ;;  %v834_v17 = vpop.f32.mrb[4].mxu0  ;;  %v534_v14 = vld [vmem:[%s1254_s5] sm:$0x3] }
  0xf9   :  { %411 = vmatprep.mubr.f32.mxu0 %v940_v4  ;;  %v206_v18 = vpop.f32.mrb[5].mxu0  ;;  %v284_v33 = vmin.f32 %v268_v26, 6.0  ;;  %v212_v34 = vadd.f32 %v834_v17, %v1072_v5 }
  0xfa   :  { %v283_v21 = vmin.f32 %v267_v16, 6.0  ;;  %v207_v22 = vadd.f32 %v1072_v5, %v206_v18 }
  0xfb   :  { %v270_v42 = vmax.f32 %v212_v34, 0.0 }
  0xfc   :  { %412 = vmatmul.mubr.f32.gmra.mrb[18].mxu0 %v282_v19  ;;  %v837_v23 = vpop.f32.mrb[6].mxu0  ;;  %v269_v28 = vmax.f32 %v207_v22, 0.0 }
  0xfd   :  { %417 = vmatprep.mubr.f32.mxu0 %v940_v4  ;;  %v222_v24 = vadd.f32 %v837_v23, %v1072_v5  ;;  %v216_v25 = vpop.f32.mrb[7].mxu0  ;;  %v286_v51 = vmin.f32 %v270_v42, 6.0 }
  0xfe   :  { %v285_v36 = vmin.f32 %v269_v28, 6.0  ;;  %v217_v37 = vadd.f32 %v1072_v5, %v216_v25 }
  0xff   :  { %v272_v27 = vmax.f32 %v222_v24, 0.0 }
 0x100   :  { %418 = vmatmul.mubr.f32.gmra.mrb[20].mxu0 %v283_v21  ;;  %v840_v29 = vpop.f32.mrb[8].mxu0  ;;  %v271_v45 = vmax.f32 %v217_v37, 0.0 }
 0x101   :  { %423 = vmatprep.mubr.f32.mxu0 %v940_v4  ;;  %v288_v30 = vmin.f32 %v272_v27, 6.0  ;;  %v232_v31 = vadd.f32 %v840_v29, %v1072_v5  ;;  %v226_v32 = vpop.f32.mrb[9].mxu0 }
 0x102   :  { %v227_v35 = vadd.f32 %v1072_v5, %v226_v32  ;;  %v287_v52 = vmin.f32 %v271_v45, 6.0 }
 0x103   :  { %448 = vmatmul.mubr.f32.vlgmr.msra.gmra.mrb[0].mxu1 %v288_v30  ;;  %v274_v38 = vmax.f32 %v232_v31, 0.0 }
 0x104   :  { %424 = vmatmul.mubr.f32.gmra.mrb[22].mxu0 %v284_v33  ;;  %v273_v39 = vmax.f32 %v227_v35, 0.0  ;;  %453 = vmatprep.mubr.f32.mxu1 %v940_v4  ;;  %v843_v40 = vpop.f32.mrb[10].mxu0 }
 0x105   :  { %429 = vmatprep.mubr.f32.mxu0 %v940_v4  ;;  %v236_v41 = vpop.f32.mrb[11].mxu0  ;;  %v290_v46 = vmin.f32 %v274_v38, 6.0  ;;  %v242_v47 = vadd.f32 %v843_v40, %v1072_v5 }
 0x106   :  { %v289_v43 = vmin.f32 %v273_v39, 6.0  ;;  %v237_v44 = vadd.f32 %v1072_v5, %v236_v41 }
 0x107   :  { %v276_v53 = vmax.f32 %v242_v47, 0.0 }
 0x108   :  { %430 = vmatmul.mubr.f32.gmra.mrb[24].mxu0 %v285_v36  ;;  %454 = vmatmul.mubr.f32.gmra.mrb[2].mxu1 %v289_v43  ;;  %v275_v48 = vmax.f32 %v237_v44, 0.0  ;;  %v846_v49 = vpop.f32.mrb[12].mxu0 }
 0x109   :  { %435 = vmatprep.mubr.f32.mxu0 %v940_v4  ;;  %459 = vmatprep.mubr.f32.mxu1 %v940_v4  ;;  %v246_v50 = vpop.f32.mrb[13].mxu0  ;;  %v292_v58 = vmin.f32 %v276_v53, 6.0  ;;  %v252_v59 = vadd.f32 %v846_v49, %v1072_v5 }
 0x10a   :  { %v291_v54 = vmin.f32 %v275_v48, 6.0  ;;  %v247_v55 = vadd.f32 %v1072_v5, %v246_v50 }
 0x10b   :  { %v278_v61 = vmax.f32 %v252_v59, 0.0 }
 0x10c   :  { %436 = vmatmul.mubr.f32.gmra.mrb[26].mxu0 %v286_v51  ;;  %460 = vmatmul.mubr.f32.gmra.mrb[4].mxu1 %v290_v46  ;;  %v849_v56 = vpop.f32.mrb[14].mxu0  ;;  %v277_v60 = vmax.f32 %v247_v55, 0.0 }
 0x10d   :  { %441 = vmatprep.mubr.f32.mxu0 %v940_v4  ;;  %465 = vmatprep.mubr.f32.mxu1 %v940_v4  ;;  %v256_v57 = vpop.f32.mrb[15].mxu0  ;;  %v294_v0 = vmin.f32 %v278_v61, 6.0  ;;  %v262_v1 = vadd.f32 %v849_v56, %v1072_v5 }
 0x10e   :  { %v293_v62 = vmin.f32 %v277_v60, 6.0  ;;  %v257_v63 = vadd.f32 %v1072_v5, %v256_v57  ;;  %v1105_v5 = vshrl.u32 %v331_v9, 7 }
 0x10f   :  { %v280_v3 = vmax.f32 %v262_v1, 0.0 }
 0x110   :  { %442 = vmatmul.mubr.f32.gmra.mrb[28].mxu0 %v287_v52  ;;  %466 = vmatmul.mubr.f32.gmra.mrb[6].mxu1 %v291_v54  ;;  %v279_v2 = vmax.f32 %v257_v63, 0.0  ;;  %v1108_v10 = vsub.s32 0, %v1105_v5  ;;  %v337_v12 = vsub.s32 1, %v1105_v5 }
 0x111   :  { %471 = vmatprep.mubr.f32.mxu1 %v940_v4  ;;  %v296_v7 = vmin.f32 %v280_v3, 6.0 }
 0x112   :  { %v295_v6 = vmin.f32 %v279_v2, 6.0  ;;  %v1115_v13 = vrot.slane %v329_v11, %v1108_v10  ;;  %v1124_v18 = vrot.slane %v534_v14, %v1108_v10  ;;  %v1127_v20 = vrot.slane %v534_v14, %v337_v12 }
 0x114   :  { %472 = vmatmul.mubr.f32.gmra.mrb[8].mxu1 %v292_v58 }
 0x115   :  { %477 = vmatprep.mubr.f32.mxu1 %v940_v4 }
 0x118   :  { %478 = vmatmul.mubr.f32.gmra.mrb[10].mxu1 %v293_v62 }
 0x119   :  { %483 = vmatprep.mubr.f32.mxu1 %v940_v4 }
 0x11c   :  { %484 = vmatmul.mubr.f32.gmra.mrb[12].mxu1 %v294_v0 }
 0x11d   :  { %489 = vmatprep.mubr.f32.mxu1 %v940_v4 }
 0x120   :  { %490 = vmatmul.mubr.f32.gmra.mrb[14].mxu1 %v295_v6 }
 0x121   :  { %495 = vmatprep.mubr.f32.mxu1 %v940_v4  ;;  %v1117_v4 = vrot.slane %v329_v11, %v337_v12 }
 0x124   :  { %496 = vmatmul.mubr.f32.gmra.mrb[16].mxu1 %v296_v7 }
 0x1cb   :  { %v407_v15 = vpop.f32.mrb[16].mxu0 }
 0x1cc   :  { %v408_v16 = vadd.f32 %v407_v15, %v1115_v13  ;;  %v409_v17 = vpop.f32.mrb[17].mxu0 }
 0x1cd   :  { %v410_v19 = vadd.f32 %v409_v17, %v1117_v4 }
 0x1ce   :  { %v502_v21 = vmax.f32 %v408_v16, 0.0 }
 0x1cf   :  { %v503_v22 = vmax.f32 %v410_v19, 0.0  ;;  %v413_v23 = vpop.f32.mrb[18].mxu0 }
 0x1d0   :  { %v414_v24 = vadd.f32 %v413_v23, %v1115_v13  ;;  %v415_v25 = vpop.f32.mrb[19].mxu0  ;;  %v546_v26 = vmul.f32 %v1124_v18, %v502_v21 }
 0x1d1   :  { %v416_v27 = vadd.f32 %v415_v25, %v1117_v4  ;;  %v547_v28 = vmul.f32 %v1127_v20, %v503_v22 }
 0x1d2   :  { %v504_v29 = vmax.f32 %v414_v24, 0.0 }
 0x1d3   :  { %v505_v30 = vmax.f32 %v416_v27, 0.0  ;;  %v419_v31 = vpop.f32.mrb[20].mxu0  ;;  %v578_v32 = vadd.f32 %v547_v28, %v546_v26 }
 0x1d4   :  { %v548_v33 = vmul.f32 %v1124_v18, %v504_v29  ;;  %v420_v34 = vadd.f32 %v419_v31, %v1115_v13  ;;  %v421_v35 = vpop.f32.mrb[21].mxu0 }
 0x1d5   :  { %v549_v36 = vmul.f32 %v1127_v20, %v505_v30  ;;  %v422_v37 = vadd.f32 %v421_v35, %v1117_v4  ;;  %579 = vadd.xlane.f32.xlu0 %v578_v32 }
 0x1d6   :  { %v506_v38 = vmax.f32 %v420_v34, 0.0  ;;  %v449_v39 = vpop.f32.mrb[0].mxu1 }
 0x1d7   :  { %v507_v40 = vmax.f32 %v422_v37, 0.0  ;;  %v425_v41 = vpop.f32.mrb[22].mxu0  ;;  %v581_v42 = vadd.f32 %v549_v36, %v548_v33  ;;  %v450_v43 = vadd.f32 %v449_v39, %v1115_v13  ;;  %v451_v44 = vpop.f32.mrb[1].mxu1 }
 0x1d8   :  { %v426_v45 = vadd.f32 %v425_v41, %v1115_v13  ;;  %v427_v46 = vpop.f32.mrb[23].mxu0  ;;  %v550_v47 = vmul.f32 %v1124_v18, %v506_v38  ;;  %v452_v48 = vadd.f32 %v451_v44, %v1117_v4 }
 0x1d9   :  { %v428_v49 = vadd.f32 %v427_v46, %v1117_v4  ;;  %582 = vadd.xlane.f32.xlu0 %v581_v42  ;;  %v551_v50 = vmul.f32 %v1127_v20, %v507_v40  ;;  %v516_v51 = vmax.f32 %v450_v43, 0.0 }
 0x1da   :  { %v508_v52 = vmax.f32 %v426_v45, 0.0  ;;  %v517_v53 = vmax.f32 %v452_v48, 0.0 }
 0x1db   :  { %v509_v54 = vmax.f32 %v428_v49, 0.0  ;;  %v431_v55 = vpop.f32.mrb[24].mxu0  ;;  %v584_v56 = vadd.f32 %v551_v50, %v550_v47  ;;  %v560_v57 = vmul.f32 %v1124_v18, %v516_v51  ;;  %v455_v58 = vpop.f32.mrb[2].mxu1 }
 0x1dc   :  { %v552_v59 = vmul.f32 %v1124_v18, %v508_v52  ;;  %v432_v60 = vadd.f32 %v431_v55, %v1115_v13  ;;  %v433_v61 = vpop.f32.mrb[25].mxu0  ;;  %v561_v62 = vmul.f32 %v1127_v20, %v517_v53  ;;  %v456_v63 = vadd.f32 %v455_v58, %v1115_v13  ;;  %v457_v0 = vpop.f32.mrb[3].mxu1 }
 0x1dd   :  { %v553_v1 = vmul.f32 %v1127_v20, %v509_v54  ;;  %v434_v2 = vadd.f32 %v433_v61, %v1117_v4  ;;  %585 = vadd.xlane.f32.xlu1 %v584_v56  ;;  %v458_v3 = vadd.f32 %v457_v0, %v1117_v4 }
 0x1de   :  { %v510_v6 = vmax.f32 %v432_v60, 0.0  ;;  %v518_v7 = vmax.f32 %v456_v63, 0.0  ;;  %v599_v8 = vadd.f32 %v561_v62, %v560_v57 }
 0x1df   :  { %v511_v11 = vmax.f32 %v434_v2, 0.0  ;;  %v437_v12 = vpop.f32.mrb[26].mxu0  ;;  %v587_v14 = vadd.f32 %v553_v1, %v552_v59  ;;  %v519_v15 = vmax.f32 %v458_v3, 0.0  ;;  %v461_v16 = vpop.f32.mrb[4].mxu1 }
 0x1e0   :  { %v554_v17 = vmul.f32 %v1124_v18, %v510_v6  ;;  %v438_v19 = vadd.f32 %v437_v12, %v1115_v13  ;;  %v439_v21 = vpop.f32.mrb[27].mxu0  ;;  %v562_v22 = vmul.f32 %v1124_v18, %v518_v7  ;;  %v462_v23 = vadd.f32 %v461_v16, %v1115_v13  ;;  %v463_v24 = vpop.f32.mrb[5].mxu1 }
 0x1e1   :  { %v555_v25 = vmul.f32 %v1127_v20, %v511_v11  ;;  %v440_v26 = vadd.f32 %v439_v21, %v1117_v4  ;;  %588 = vadd.xlane.f32.xlu1 %v587_v14  ;;  %v563_v27 = vmul.f32 %v1127_v20, %v519_v15  ;;  %v464_v28 = vadd.f32 %v463_v24, %v1117_v4 }
 0x1e2   :  { %v512_v29 = vmax.f32 %v438_v19, 0.0  ;;  %v520_v30 = vmax.f32 %v462_v23, 0.0 }
 0x1e3   :  { %v513_v31 = vmax.f32 %v440_v26, 0.0  ;;  %v590_v32 = vadd.f32 %v555_v25, %v554_v17  ;;  %v521_v33 = vmax.f32 %v464_v28, 0.0  ;;  %v443_v34 = vpop.f32.mrb[28].mxu0  ;;  %v602_v35 = vadd.f32 %v563_v27, %v562_v22  ;;  %v467_v36 = vpop.f32.mrb[6].mxu1 }
 0x1e4   :  { %v556_v37 = vmul.f32 %v1124_v18, %v512_v29  ;;  %v564_v38 = vmul.f32 %v1124_v18, %v520_v30  ;;  %v444_v39 = vadd.f32 %v443_v34, %v1115_v13  ;;  %v445_v40 = vpop.f32.mrb[29].mxu0  ;;  %v468_v41 = vadd.f32 %v467_v36, %v1115_v13  ;;  %v469_v42 = vpop.f32.mrb[7].mxu1 }
 0x1e5   :  { %v557_v43 = vmul.f32 %v1127_v20, %v513_v31  ;;  %591 = vadd.xlane.f32.xlu0 %v590_v32  ;;  %v565_v44 = vmul.f32 %v1127_v20, %v521_v33  ;;  %v446_v45 = vadd.f32 %v445_v40, %v1117_v4  ;;  %v470_v46 = vadd.f32 %v469_v42, %v1117_v4  ;;  %v626_v33 = vld [vmem:[#allocation2] sm:$0x1] }
 0x1e6   :  { %v514_v47 = vmax.f32 %v444_v39, 0.0  ;;  %v522_v48 = vmax.f32 %v468_v41, 0.0 }
 0x1e7   :  { %v593_v49 = vadd.f32 %v557_v43, %v556_v37  ;;  %v515_v50 = vmax.f32 %v446_v45, 0.0  ;;  %v523_v51 = vmax.f32 %v470_v46, 0.0  ;;  %v473_v52 = vpop.f32.mrb[8].mxu1  ;;  %v605_v53 = vadd.f32 %v565_v44, %v564_v38 }
 0x1e8   :  { %v558_v54 = vmul.f32 %v1124_v18, %v514_v47  ;;  %v566_v55 = vmul.f32 %v1124_v18, %v522_v48  ;;  %v474_v56 = vadd.f32 %v473_v52, %v1115_v13  ;;  %v475_v57 = vpop.f32.mrb[9].mxu1 }
 0x1e9   :  { %594 = vadd.xlane.f32.xlu1 %v593_v49  ;;  %600 = vadd.xlane.f32.xlu0 %v599_v8  ;;  %v559_v58 = vmul.f32 %v1127_v20, %v515_v50  ;;  %v567_v59 = vmul.f32 %v1127_v20, %v523_v51  ;;  %v476_v60 = vadd.f32 %v475_v57, %v1117_v4 }
 0x1ea   :  { %v524_v61 = vmax.f32 %v474_v56, 0.0 }
 0x1eb   :  { %v525_v62 = vmax.f32 %v476_v60, 0.0  ;;  %v479_v63 = vpop.f32.mrb[10].mxu1  ;;  %v596_v0 = vadd.f32 %v559_v58, %v558_v54  ;;  %v608_v1 = vadd.f32 %v567_v59, %v566_v55  ;;  %v1192_v54 = vand.u32 127, %v331_v9 }
 0x1ec   :  { %v568_v2 = vmul.f32 %v1124_v18, %v524_v61  ;;  %v480_v3 = vadd.f32 %v479_v63, %v1115_v13  ;;  %v481_v6 = vpop.f32.mrb[11].mxu1 }
 0x1ed   :  { %603 = vadd.xlane.f32.xlu0 %v602_v35  ;;  %v569_v7 = vmul.f32 %v1127_v20, %v525_v62  ;;  %v482_v8 = vadd.f32 %v481_v6, %v1117_v4  ;;  %v674_v56 = vadd.s32 4294967288, %v1192_v54  ;;  %v681_v57 = vadd.s32 4294967280, %v1192_v54 }
 0x1ee   :  { %v526_v11 = vmax.f32 %v480_v3, 0.0  ;;  %v672_v60 = vsub.s32 %v1192_v54, %v1105_v5 }
 0x1ef   :  { %v527_v12 = vmax.f32 %v482_v8, 0.0  ;;  %v485_v14 = vpop.f32.mrb[12].mxu1  ;;  %v611_v15 = vadd.f32 %v569_v7, %v568_v2  ;;  %v677_v61 = vsub.s32 %v674_v56, %v1105_v5  ;;  %v684_v63 = vsub.s32 %v681_v57, %v1105_v5 }
 0x1f0   :  { %v570_v16 = vmul.f32 %v1124_v18, %v526_v11  ;;  %v486_v17 = vadd.f32 %v485_v14, %v1115_v13  ;;  %v487_v19 = vpop.f32.mrb[13].mxu1  ;;  %v695_v2 = vadd.s32 4294967264, %v1192_v54  ;;  %v702_v14 = vadd.s32 4294967256, %v1192_v54 }
 0x1f1   :  { %606 = vadd.xlane.f32.xlu0 %v605_v53  ;;  %v571_v21 = vmul.f32 %v1127_v20, %v527_v12  ;;  %v488_v22 = vadd.f32 %v487_v19, %v1117_v4 }
 0x1f2   :  { %v528_v23 = vmax.f32 %v486_v17, 0.0  ;;  %v698_v12 = vsub.s32 %v695_v2, %v1105_v5  ;;  %v709_v17 = vadd.s32 4294967248, %v1192_v54 }
 0x1f3   :  { %v529_v24 = vmax.f32 %v488_v22, 0.0  ;;  %v491_v25 = vpop.f32.mrb[14].mxu1  ;;  %v614_v26 = vadd.f32 %v571_v21, %v570_v16 }
 0x1f4   :  { %v572_v27 = vmul.f32 %v1124_v18, %v528_v23  ;;  %v492_v28 = vadd.f32 %v491_v25, %v1115_v13  ;;  %v493_v29 = vpop.f32.mrb[15].mxu1 }
 0x1f5   :  { %597 = vadd.xlane.f32.xlu0 %v596_v0  ;;  %v573_v30 = vmul.f32 %v1127_v20, %v529_v24  ;;  %v494_v31 = vadd.f32 %v493_v29, %v1117_v4  ;;  %v705_v24 = vsub.s32 %v702_v14, %v1105_v5 }
 0x1f6   :  { %v530_v32 = vmax.f32 %v492_v28, 0.0  ;;  %v716_v28 = vadd.s32 4294967240, %v1192_v54 }
 0x1f7   :  { %v531_v34 = vmax.f32 %v494_v31, 0.0  ;;  %v497_v35 = vpop.f32.mrb[16].mxu1  ;;  %v617_v36 = vadd.f32 %v573_v30, %v572_v27  ;;  %v723_v30 = vadd.s32 4294967232, %v1192_v54 }
 0x1f8   :  { %v574_v37 = vmul.f32 %v1124_v18, %v530_v32  ;;  %v498_v38 = vadd.f32 %v497_v35, %v1115_v13  ;;  %v499_v39 = vpop.f32.mrb[17].mxu1 }
 0x1f9   :  { %609 = vadd.xlane.f32.xlu0 %v608_v1  ;;  %v575_v40 = vmul.f32 %v1127_v20, %v531_v34  ;;  %v500_v41 = vadd.f32 %v499_v39, %v1117_v4  ;;  %v688_v1 = vadd.s32 4294967272, %v1192_v54 }
 0x1fa   :  { %629 = vperm.xlu1 %910, %v626_v33   ;;  %v532_v42 = vmax.f32 %v498_v38, 0.0  ;;  %v726_v38 = vsub.s32 %v723_v30, %v1105_v5 }
 0x1fb   :  { %v533_v43 = vmax.f32 %v500_v41, 0.0  ;;  %v620_v44 = vadd.f32 %v575_v40, %v574_v37  ;;  %v691_v11 = vsub.s32 %v688_v1, %v1105_v5  ;;  %v730_v37 = vadd.s32 4294967224, %v1192_v54 }
 0x1fc   :  { %v576_v45 = vmul.f32 %v1124_v18, %v532_v42  ;;  %v737_v41 = vadd.s32 4294967216, %v1192_v54 }
 0x1fd   :  { %615 = vadd.xlane.f32.xlu0 %v614_v26  ;;  %v577_v46 = vmul.f32 %v1127_v20, %v533_v43  ;;  %v712_v26 = vsub.s32 %v709_v17, %v1105_v5  ;;  %v733_v43 = vsub.s32 %v730_v37, %v1105_v5 }
 0x1ff   :  { %v623_v47 = vadd.f32 %v577_v46, %v576_v45 }
 0x201   :  { %618 = vadd.xlane.f32.xlu0 %v617_v36  ;;  %v719_v36 = vsub.s32 %v716_v28, %v1105_v5 }
 0x205   :  { %621 = vadd.xlane.f32.xlu0 %v620_v44 }
 0x209   :  { %624 = vadd.xlane.f32.xlu0 %v623_v47  ;;  %v744_v47 = vadd.s32 4294967208, %v1192_v54 }
 0x21e   :  { %612 = vadd.xlane.f32.xlu1 %v611_v15 }
 0x262   :  { %v580_v13 = vpop.xlane.xlu0 %579 }
 0x266   :  { %v583_v48 = vpop.xlane.xlu0 %582 }
 0x26a   :  { %v586_v49 = vpop.xlane.xlu1 %585 }
 0x26e   :  { %v589_v51 = vpop.xlane.xlu1 %588 }
 0x272   :  { %v592_v50 = vpop.xlane.xlu0 %591 }
 0x276   :  { %v601_v4 = vpop.xlane.xlu0 %600  ;;  %v595_v52 = vpop.xlane.xlu1 %594 }
 0x27a   :  { %v604_v53 = vpop.xlane.xlu0 %603  ;;  %v630_v18 = vpop.permute.xlu1 %629 }
 0x27b   :  { %v1195_v20 = vrot.slane %v630_v18, %v1108_v10  ;;  %v772_v18 = vadd.s32 4294967176, %v1192_v54 }
 0x27d   :  { %v636_v58 = vadd.f32 %v1195_v20, %v580_v13  ;;  %v637_v59 = vadd.f32 %v1195_v20, %v583_v48  ;;  %v638_v62 = vadd.f32 %v1195_v20, %v586_v49  ;;  %v639_v7 = vadd.f32 %v1195_v20, %v589_v51 }
 0x27e   :  { %v607_v55 = vpop.xlane.xlu0 %606  ;;  %v640_v15 = vadd.f32 %v1195_v20, %v592_v50  ;;  %v641_v22 = vadd.f32 %v1195_v20, %v595_v52  ;;  %v643_v34 = vadd.f32 %v1195_v20, %v601_v4  ;;  %v644_v39 = vadd.f32 %v1195_v20, %v604_v53 }
 0x27f   :  { %v673_v10 = vrot.slane %v636_v58, %v672_v60  ;;  %v678_v0 = vrot.slane %v637_v59, %v677_v61  ;;  %v685_v3 = vrot.slane %v638_v62, %v684_v63  ;;  %v692_v19 = vrot.slane %v639_v7, %v691_v11 }
 0x280   :  { %v699_v25 = vrot.slane %v640_v15, %v698_v12  ;;  %v706_v31 = vrot.slane %v641_v22, %v705_v24  ;;  %v720_v42 = vrot.slane %v643_v34, %v719_v36  ;;  %v645_v45 = vadd.f32 %v1195_v20, %v607_v55 }
 0x281   :  { %v680_v8 = vsel %vm679_vm4, %v678_v0, %v673_v10  ;;  %v727_v13 = vrot.slane %v644_v39, %v726_v38  ;;  %v740_v48 = vsub.s32 %v737_v41, %v1105_v5  ;;  %v751_v50 = vadd.s32 4294967200, %v1192_v54 }
 0x282   :  { %v598_v9 = vpop.xlane.xlu0 %597  ;;  %v687_v16 = vsel %vm686_vm5, %v685_v3, %v680_v8  ;;  %v758_v51 = vadd.s32 4294967192, %v1192_v54  ;;  %v765_v52 = vadd.s32 4294967184, %v1192_v54  ;;  %v734_v53 = vrot.slane %v645_v45, %v733_v43 }
 0x283   :  { %v694_v23 = vsel %vm693_vm6, %v692_v19, %v687_v16  ;;  %v642_v27 = vadd.f32 %v1195_v20, %v598_v9  ;;  %v747_v55 = vsub.s32 %v744_v47, %v1105_v5  ;;  %v754_v57 = vsub.s32 %v751_v50, %v1105_v5 }
 0x284   :  { %v701_v29 = vsel %vm700_vm7, %v699_v25, %v694_v23  ;;  %v761_v9 = vsub.s32 %v758_v51, %v1105_v5  ;;  %v768_v10 = vsub.s32 %v765_v52, %v1105_v5  ;;  %v775_v0 = vsub.s32 %v772_v18, %v1105_v5 }
 0x285   :  { %v713_v32 = vrot.slane %v642_v27, %v712_v26  ;;  %v708_v35 = vsel %vm707_vm8, %v706_v31, %v701_v29 }
 0x286   :  { %v610_v6 = vpop.xlane.xlu0 %609 }
 0x287   :  { %v715_v40 = vsel %vm714_vm9, %v713_v32, %v708_v35  ;;  %v646_v49 = vadd.f32 %v1195_v20, %v610_v6 }
 0x288   :  { %v722_v46 = vsel %vm721_vm10, %v720_v42, %v715_v40 }
 0x289   :  { %v729_v4 = vsel %vm728_vm11, %v727_v13, %v722_v46  ;;  %v741_v56 = vrot.slane %v646_v49, %v740_v48 }
 0x28a   :  { %v616_v21 = vpop.xlane.xlu0 %615  ;;  %v736_v61 = vsel %vm735_vm12, %v734_v53, %v729_v4 }
 0x28b   :  { %v648_v58 = vadd.f32 %v1195_v20, %v616_v21  ;;  %v743_v3 = vsel %vm742_vm13, %v741_v56, %v736_v61 }
 0x28d   :  { %v755_v6 = vrot.slane %v648_v58, %v754_v57 }
 0x28e   :  { %v619_v33 = vpop.xlane.xlu0 %618 }
 0x28f   :  { %v649_v62 = vadd.f32 %v1195_v20, %v619_v33 }
 0x291   :  { %v762_v7 = vrot.slane %v649_v62, %v761_v9 }
 0x292   :  { %v622_v44 = vpop.xlane.xlu0 %621 }
 0x293   :  { %v650_v54 = vadd.f32 %v1195_v20, %v622_v44 }
 0x295   :  { %v769_v11 = vrot.slane %v650_v54, %v768_v10 }
 0x296   :  { %v625_v59 = vpop.xlane.xlu0 %624 }
 0x297   :  { %v651_v1 = vadd.f32 %v1195_v20, %v625_v59 }
 0x299   :  { %v776_v14 = vrot.slane %v651_v1, %v775_v0 }
 0x2ab   :  { %v613_v60 = vpop.xlane.xlu1 %612 }
 0x2ac   :  { %v647_v63 = vadd.f32 %v1195_v20, %v613_v60 }
 0x2ae   :  { %v748_v2 = vrot.slane %v647_v63, %v747_v55 }
 0x2b0   :  { %v750_v8 = vsel %vm749_vm14, %v748_v2, %v743_v3 }
 0x2b1   :  { %v757_v12 = vsel %vm756_vm15, %v755_v6, %v750_v8 }
 0x2b2   :  { %v764_v15 = vsel %vm763_vm0, %v762_v7, %v757_v12 }
 0x2b3   :  { %v771_v16 = vsel %vm770_vm1, %v769_v11, %v764_v15 }
 0x2b4   :  { %v778_v17 = vsel %vm777_vm2, %v776_v14, %v771_v16 }
 0x2b5   :  { %780 = vst [vmem:[%s1256_s7] sm:$0x1] %v778_v17 }
 0x2b6   :  { %785 = vsyncpa [#allocation4], 1 }

</bundles_post_ra>
